<compile_context>
chip_gen: v7x
topology: tpu7x:2x2x1
jax: 0.10.0
libtpu: 0.0.40
codegen_flags: <defaults>
</compile_context>

<pallas_src>
import jax
import jax.numpy as jnp
from jax.experimental import pallas as pl
from jax.experimental.pallas import tpu as pltpu


# --------------------------------------------------------------------------
# Kernel A: pointwise_conv1 (fused GLU halves) + GLU + causal depthwise conv
#           + per-batch-row BatchNorm partial statistics.
# --------------------------------------------------------------------------
def _conv_glu_kernel(x_ref, w1_ref, b1_ref, dw_ref, db_ref,
                     y_ref, psum_ref, psumsq_ref, prev_ref):
    t = pl.program_id(1)
    TT, D = x_ref.shape[1], x_ref.shape[2]
    K = dw_ref.shape[0]

    # NOTE: correctness relies on the T grid axis being iterated sequentially
    # per batch row ("arbitrary") with re-init at t == 0; do not mark it
    # "parallel".
    @pl.when(t == 0)
    def _():
        prev_ref[...] = jnp.zeros_like(prev_ref)      # left zero-pad (lorder)
        psum_ref[...] = jnp.zeros_like(psum_ref)
        psumsq_ref[...] = jnp.zeros_like(psumsq_ref)

    # ---- pointwise_conv1: both GLU halves fused into one (D, 2D) matmul ----
    xb = x_ref[0].astype(jnp.bfloat16)                                  # (TT, D)
    h = jnp.dot(xb, w1_ref[...], preferred_element_type=jnp.float32)    # (TT, 2D)
    h = h + b1_ref[...]
    glu = h[:, :D] * jax.nn.sigmoid(h[:, D:])                           # (TT, D) f32

    # ---- causal depthwise conv via XLU rolls (no misaligned slices) ----
    dw = dw_ref[...]                                                    # (K, D)
    prev = prev_ref[...]                                                # (TT, D)
    row = jax.lax.broadcasted_iota(jnp.int32, (TT, 1), 0)

    y = glu * dw[K - 1:K, :] + db_ref[...]        # tap K-1: window == glu itself
    for j in range(K - 1):                        # static, small K
        s = K - 1 - j
        cur_roll = pltpu.roll(glu, shift=s, axis=0)    # rows >= s: glu[i-s]
        prev_roll = pltpu.roll(prev, shift=s, axis=0)  # rows <  s: prev[TT-s+i]
        tap = jnp.where(row >= s, cur_roll, prev_roll)
        y = y + tap * dw[j:j + 1, :]

    prev_ref[...] = glu                            # history for the next T-tile

    y_ref[0] = y.astype(y_ref.dtype)               # bf16 HBM intermediate

    # Single-pass BatchNorm partials, accumulated across the t sweep.
    # (E[y^2]-E[y]^2 in f32; acceptable here, Welford combine if mean >> std.)
    psum_ref[0] = psum_ref[0] + jnp.sum(y, axis=0, keepdims=True)
    psumsq_ref[0] = psumsq_ref[0] + jnp.sum(y * y, axis=0, keepdims=True)


# --------------------------------------------------------------------------
# Kernel B: folded BatchNorm (y*scale + shift) + ReLU + pointwise_conv2.
#           Operates on y flattened to (B*T, D); no cross-row dependence.
# --------------------------------------------------------------------------
def _bn_relu_pw2_kernel(y_ref, scale_ref, shift_ref, w2_ref, b2_ref, out_ref):
    y = y_ref[...].astype(jnp.float32)                                  # (TT, D)
    act = jnp.maximum(y * scale_ref[...] + shift_ref[...], 0.0)
    out = jnp.dot(act.astype(jnp.bfloat16), w2_ref[...],
                  preferred_element_type=jnp.float32) + b2_ref[...]
    out_ref[...] = out.astype(out_ref.dtype)


def _pick_row_tile(n, cap=2048):
    # Large tiles amortize per-grid-step overhead and MXU fill/drain; even at
    # 2048 rows the double-buffered blocks stay a few MiB, far under the
    # 32 MiB scoped VMEM budget (safe on v5e/v6e 128 MiB and v7x 64 MiB).
    for tt in (2048, 1024, 512, 256, 128, 64, 32, 16, 8):
        if tt <= cap and n % tt == 0:
            return tt
    # TODO(synk): for large n with no divisor in the list, switch to a
    # pl.cdiv grid with a masked tail instead of one full-n block.
    return n


def causal_convolution_forward(x, params, eps=1e-5):
    """x: (B, T, D) float32. Returns (out (B, T, D), cache=None)."""
    B, T, D = x.shape
    K = params["dw"].shape[0]
    TT = _pick_row_tile(T)
    num_t = T // TT if T % TT == 0 else 1
    assert TT >= K - 1, "row tile must cover the causal history"

    # Fuse pointwise_conv1 ("content" | "gate") into one (D, 2D) bf16 weight.
    w1 = jnp.concatenate([params["w1a"], params["w1b"]], axis=1).astype(jnp.bfloat16)
    b1 = jnp.concatenate([params["b1a"], params["b1b"]], axis=1)        # (1, 2D) f32
    w2 = params["w2"].astype(jnp.bfloat16)

    const2 = lambda b, t: (0, 0)   # weights/biases: VMEM-resident across steps

    y, psum, psumsq = pl.pallas_call(
        _conv_glu_kernel,
        out_shape=(
            jax.ShapeDtypeStruct((B, T, D), jnp.bfloat16),
            jax.ShapeDtypeStruct((B, 1, D), jnp.float32),
            jax.ShapeDtypeStruct((B, 1, D), jnp.float32),
        ),
        grid=(B, num_t),
        in_specs=[
            pl.BlockSpec((1, TT, D), lambda b, t: (b, t, 0)),
            pl.BlockSpec((D, 2 * D), const2),
            pl.BlockSpec((1, 2 * D), const2),
            pl.BlockSpec((K, D), const2),
            pl.BlockSpec((1, D), const2),
        ],
        out_specs=(
            pl.BlockSpec((1, TT, D), lambda b, t: (b, t, 0)),
            pl.BlockSpec((1, 1, D), lambda b, t: (b, 0, 0)),   # accumulator over t
            pl.BlockSpec((1, 1, D), lambda b, t: (b, 0, 0)),   # accumulator over t
        ),
        scratch_shapes=[pltpu.VMEM((TT, D), jnp.float32)],     # previous tile's GLU
        compiler_params=pltpu.CompilerParams(
            dimension_semantics=("parallel", "arbitrary"),
            vmem_limit_bytes=32 * 1024 * 1024,
        ),
        cost_estimate=pl.CostEstimate(
            flops=4 * B * T * D * D + (2 * K + 8) * B * T * D,
            transcendentals=B * T * D,
            bytes_accessed=6 * B * T * D + 4 * D * D + 8 * B * D,
        ),
    )(x, w1, b1, params["dw"], params["db"])

    # ---- tiny XLA reduce: fold batch stats into per-channel scale/shift ----
    # (training-mode BatchNorm1d: batch statistics, biased variance)
    n = B * T
    s = jnp.sum(psum, axis=(0, 1))
    ss = jnp.sum(psumsq, axis=(0, 1))
    mean = s / n
    var = jnp.maximum(ss / n - mean * mean, 0.0)
    scale = params["gamma"] * jax.lax.rsqrt(var + eps)                  # (1, D)
    shift = params["beta"] - mean * scale                               # (1, D)

    # ---- Kernel B on flattened rows: bigger M per matmul, fewer steps ----
    rows = B * T
    TT2 = _pick_row_tile(rows)
    num_r = rows // TT2 if rows % TT2 == 0 else 1
    y2 = y.reshape(rows, D)
    const1 = lambda i: (0, 0)

    out = pl.pallas_call(
        _bn_relu_pw2_kernel,
        out_shape=jax.ShapeDtypeStruct((rows, D), x.dtype),
        grid=(num_r,),
        in_specs=[
            pl.BlockSpec((TT2, D), lambda i: (i, 0)),
            pl.BlockSpec((1, D), const1),
            pl.BlockSpec((1, D), const1),
            pl.BlockSpec((D, D), const1),
            pl.BlockSpec((1, D), const1),
        ],
        out_specs=pl.BlockSpec((TT2, D), lambda i: (i, 0)),
        compiler_params=pltpu.CompilerParams(
            dimension_semantics=("parallel",),
            vmem_limit_bytes=32 * 1024 * 1024,
        ),
        cost_estimate=pl.CostEstimate(
            flops=2 * B * T * D * D + 4 * B * T * D,
            transcendentals=0,
            bytes_accessed=6 * B * T * D + 2 * D * D,
        ),
    )(y2, scale, shift, w2, params["b2"])

    # TODO(synk): streaming path (cache is not None): concatenating the cache
    # along T and emitting the updated (1, K-1, D) cache is not implemented;
    # with cache=None the module returns cache unchanged (None).
    return out.reshape(B, T, D), None


# --------------------------------------------------------------------------
# Pure-JAX mirror of the kernel math (bf16 MXU operands, f32 accumulation,
# f32 elementwise, bf16 y intermediate).  Matches a pure-f32 PyTorch forward
# to ~bf16 precision.
# --------------------------------------------------------------------------
def reference_forward(x, p, eps=1e-5):
    B, T, D = x.shape
    K = p["dw"].shape[0]
    w1 = jnp.concatenate([p["w1a"], p["w1b"]], axis=1).astype(jnp.bfloat16)
    b1 = jnp.concatenate([p["b1a"], p["b1b"]], axis=1)
    h = jnp.dot(x.reshape(B * T, D).astype(jnp.bfloat16), w1,
                preferred_element_type=jnp.float32).reshape(B, T, 2 * D) + b1
    glu = h[..., :D] * jax.nn.sigmoid(h[..., D:])
    padded = jnp.concatenate([jnp.zeros((B, K - 1, D), jnp.float32), glu], axis=1)
    y = glu * p["dw"][K - 1] + p["db"]
    for j in range(K - 1):
        y = y + padded[:, j:j + T, :] * p["dw"][j]
    n = B * T
    mean = jnp.sum(y, axis=(0, 1)) / n
    var = jnp.maximum(jnp.sum(y * y, axis=(0, 1)) / n - mean * mean, 0.0)
    scale = p["gamma"] * jax.lax.rsqrt(var + eps)
    shift = p["beta"] - mean * scale
    y_bf = y.astype(jnp.bfloat16).astype(jnp.float32)       # y round-trips as bf16
    act = jnp.maximum(y_bf * scale + shift, 0.0)
    out = jnp.dot(act.reshape(B * T, D).astype(jnp.bfloat16),
                  p["w2"].astype(jnp.bfloat16),
                  preferred_element_type=jnp.float32) + p["b2"]
    return out.reshape(B, T, D)


def init_params(key, channels, kernel_size):
    assert (kernel_size - 1) % 2 == 0
    D, K = channels, kernel_size
    ks = jax.random.split(key, 8)
    scale = 0.1
    return {
        # pointwise_conv1: torch weight (2D, D, 1) split into content/gate
        # halves, stored transposed as (D_in, D_out) for x @ W.
        "w1a": scale * jax.random.normal(ks[0], (D, D), jnp.float32),
        "b1a": scale * jax.random.normal(ks[1], (1, D), jnp.float32),
        "w1b": scale * jax.random.normal(ks[2], (D, D), jnp.float32),
        "b1b": scale * jax.random.normal(ks[3], (1, D), jnp.float32),
        # depthwise_conv: torch weight (D, 1, K) stored as (K, D).
        "dw": scale * jax.random.normal(ks[4], (K, D), jnp.float32),
        "db": scale * jax.random.normal(ks[5], (1, D), jnp.float32),
        # BatchNorm1d init: gamma=1, beta=0.
        "gamma": jnp.ones((1, D), jnp.float32),
        "beta": jnp.zeros((1, D), jnp.float32),
        # pointwise_conv2: torch weight (D, D, 1) stored transposed as (D, D).
        "w2": scale * jax.random.normal(ks[6], (D, D), jnp.float32),
        "b2": scale * jax.random.normal(ks[7], (1, D), jnp.float32),
    }


if __name__ == "__main__":
    B, T, D, K = 2, 16, 128, 3  # batch, time, channels, conv kernel size (odd)

    key = jax.random.PRNGKey(0)
    kx, kp = jax.random.split(key)
    x = jax.random.normal(kx, (B, T, D), jnp.float32)
    params = init_params(kp, D, K)

    out, cache = causal_convolution_forward(x, params)
    out = jax.block_until_ready(out)

    ref = reference_forward(x, params)
    assert out.shape == (B, T, D)
    assert cache is None
    assert jnp.allclose(out, ref, atol=5e-3, rtol=5e-3), "mismatch vs JAX reference"

    print("KERNEL_OK")
</pallas_src>

<mosaic_0001>
module attributes {stable_mosaic.version = 11 : i64} {
  func.func @_conv_glu_kernel(%arg0: i32, %arg1: i32, %arg2: memref<1x16x128xf32, #tpu.memory_space<vmem>>, %arg3: memref<128x256xbf16, #tpu.memory_space<vmem>>, %arg4: memref<1x256xf32, #tpu.memory_space<vmem>>, %arg5: memref<3x128xf32, #tpu.memory_space<vmem>>, %arg6: memref<1x128xf32, #tpu.memory_space<vmem>>, %arg7: memref<1x16x128xbf16, #tpu.memory_space<vmem>>, %arg8: memref<1x1x128xf32, #tpu.memory_space<vmem>>, %arg9: memref<1x1x128xf32, #tpu.memory_space<vmem>>, %arg10: memref<16x128xf32, #tpu.memory_space<vmem>>) attributes {dimension_semantics = [#tpu.dimension_semantics<parallel>, #tpu.dimension_semantics<arbitrary>], iteration_bounds = array<i64: 2, 1>, scalar_prefetch = 0 : i64, scratch_operands = 1 : i64, tpu.core_type = #tpu.core_type<tc>, window_params = [{transform_indices = @transform_0, window_bounds = array<i64: 1, 16, 128>}, {pipeline_mode = #tpu.pipeline_mode<synchronous>, transform_indices = @transform_1, window_bounds = array<i64: 128, 256>}, {pipeline_mode = #tpu.pipeline_mode<synchronous>, transform_indices = @transform_2, window_bounds = array<i64: 1, 256>}, {pipeline_mode = #tpu.pipeline_mode<synchronous>, transform_indices = @transform_3, window_bounds = array<i64: 3, 128>}, {pipeline_mode = #tpu.pipeline_mode<synchronous>, transform_indices = @transform_4, window_bounds = array<i64: 1, 128>}, {transform_indices = @transform_5, window_bounds = array<i64: 1, 16, 128>}, {transform_indices = @transform_6, window_bounds = array<i64: 1, 1, 128>}, {transform_indices = @transform_7, window_bounds = array<i64: 1, 1, 128>}]} {
    %c0_i32 = arith.constant 0 : i32
    %0 = arith.cmpi eq, %arg1, %c0_i32 : i32
    %1 = arith.extui %0 : i1 to i32
    %c0_i32_0 = arith.constant 0 : i32
    %2 = arith.cmpi ne, %1, %c0_i32_0 : i32
    scf.if %2 {
      %cst_37 = arith.constant 0.000000e+00 : f32
      %72 = vector.broadcast %cst_37 : f32 to vector<16x128xf32>
      %c0_38 = arith.constant 0 : index
      %c0_39 = arith.constant 0 : index
      %73 = vector.load %arg10[%c0_38, %c0_39] : memref<16x128xf32, #tpu.memory_space<vmem>>, vector<16x128xf32>
      tpu.vector_store %arg10[%c0_38, %c0_39], %72 {strides = array<i32>} : memref<16x128xf32, #tpu.memory_space<vmem>>, vector<16x128xf32>,
      %cst_40 = arith.constant 0.000000e+00 : f32
      %74 = vector.broadcast %cst_40 : f32 to vector<1x1x128xf32>
      %c0_41 = arith.constant 0 : index
      %c0_42 = arith.constant 0 : index
      %c0_43 = arith.constant 0 : index
      %75 = vector.load %arg8[%c0_41, %c0_42, %c0_43] : memref<1x1x128xf32, #tpu.memory_space<vmem>>, vector<1x1x128xf32>
      tpu.vector_store %arg8[%c0_41, %c0_42, %c0_43], %74 {strides = array<i32>} : memref<1x1x128xf32, #tpu.memory_space<vmem>>, vector<1x1x128xf32>,
      %cst_44 = arith.constant 0.000000e+00 : f32
      %76 = vector.broadcast %cst_44 : f32 to vector<1x1x128xf32>
      %c0_45 = arith.constant 0 : index
      %c0_46 = arith.constant 0 : index
      %c0_47 = arith.constant 0 : index
      %77 = vector.load %arg9[%c0_45, %c0_46, %c0_47] : memref<1x1x128xf32, #tpu.memory_space<vmem>>, vector<1x1x128xf32>
      tpu.vector_store %arg9[%c0_45, %c0_46, %c0_47], %76 {strides = array<i32>} : memref<1x1x128xf32, #tpu.memory_space<vmem>>, vector<1x1x128xf32>,
    } else {
    }
    %c0 = arith.constant 0 : index
    %c0_1 = arith.constant 0 : index
    %c0_2 = arith.constant 0 : index
    %3 = vector.load %arg2[%c0, %c0_1, %c0_2] : memref<1x16x128xf32, #tpu.memory_space<vmem>>, vector<1x16x128xf32>
    %4 = vector.shape_cast %3 : vector<1x16x128xf32> to vector<16x128xf32>
    %5 = arith.truncf %4 : vector<16x128xf32> to vector<16x128xbf16>
    %c0_3 = arith.constant 0 : index
    %c0_4 = arith.constant 0 : index
    %6 = vector.load %arg3[%c0_3, %c0_4] : memref<128x256xbf16, #tpu.memory_space<vmem>>, vector<128x256xbf16>
    %cst = arith.constant dense<0.000000e+00> : vector<16x256xf32>
    %7 = tpu.matmul %5, %6, %cst {dimension_numbers = #tpu.dot_dimension_numbers<[1], [0], [0], [1], [0, 0, 1, 1], [], []>} : vector<16x128xbf16>, vector<128x256xbf16>, vector<16x256xf32> -> vector<16x256xf32>
    %c0_5 = arith.constant 0 : index
    %c0_6 = arith.constant 0 : index
    %8 = vector.load %arg4[%c0_5, %c0_6] : memref<1x256xf32, #tpu.memory_space<vmem>>, vector<1x256xf32>
    %9 = vector.broadcast %8 : vector<1x256xf32> to vector<16x256xf32>
    %10 = arith.addf %7, %9 : vector<16x256xf32>
    %11 = vector.extract_strided_slice %10 {offsets = [0, 0], sizes = [16, 128], strides = [1, 1]} : vector<16x256xf32> to vector<16x128xf32>
    %12 = vector.extract_strided_slice %10 {offsets = [0, 128], sizes = [16, 128], strides = [1, 1]} : vector<16x256xf32> to vector<16x128xf32>
    %13 = arith.negf %12 : vector<16x128xf32>
    %14 = math.exp %13 : vector<16x128xf32>
    %cst_7 = arith.constant 1.000000e+00 : f32
    %15 = vector.broadcast %cst_7 : f32 to vector<16x128xf32>
    %16 = arith.addf %15, %14 : vector<16x128xf32>
    %17 = arith.divf %15, %16 : vector<16x128xf32>
    %18 = arith.mulf %11, %17 : vector<16x128xf32>
    %c0_8 = arith.constant 0 : index
    %c0_9 = arith.constant 0 : index
    %19 = vector.load %arg5[%c0_8, %c0_9] : memref<3x128xf32, #tpu.memory_space<vmem>>, vector<3x128xf32>
    %c0_10 = arith.constant 0 : index
    %c0_11 = arith.constant 0 : index
    %20 = vector.load %arg10[%c0_10, %c0_11] : memref<16x128xf32, #tpu.memory_space<vmem>>, vector<16x128xf32>
    %21 = tpu.iota {dimensions = array<i32: 0>} : vector<16x1xi32>
    %22 = vector.extract_strided_slice %19 {offsets = [2, 0], sizes = [1, 128], strides = [1, 1]} : vector<3x128xf32> to vector<1x128xf32>
    %23 = vector.broadcast %22 : vector<1x128xf32> to vector<16x128xf32>
    %24 = arith.mulf %18, %23 : vector<16x128xf32>
    %c0_12 = arith.constant 0 : index
    %c0_13 = arith.constant 0 : index
    %25 = vector.load %arg6[%c0_12, %c0_13] : memref<1x128xf32, #tpu.memory_space<vmem>>, vector<1x128xf32>
    %26 = vector.broadcast %25 : vector<1x128xf32> to vector<16x128xf32>
    %27 = arith.addf %24, %26 : vector<16x128xf32>
    %c2_i32 = arith.constant 2 : i32
    %28 = tpu.dynamic_rotate %18 by %c2_i32 dim 0 : vector<16x128xf32>, i32 -> vector<16x128xf32>
    %c2_i32_14 = arith.constant 2 : i32
    %29 = tpu.dynamic_rotate %20 by %c2_i32_14 dim 0 : vector<16x128xf32>, i32 -> vector<16x128xf32>
    %c2_i32_15 = arith.constant 2 : i32
    %30 = vector.broadcast %c2_i32_15 : i32 to vector<16x1xi32>
    %31 = arith.cmpi sge, %21, %30 : vector<16x1xi32>
    %32 = vector.shape_cast %31 : vector<16x1xi1> to vector<16x1xi1>
    %33 = vector.broadcast %32 : vector<16x1xi1> to vector<16x128xi1>
    %34 = arith.select %33, %28, %29 : vector<16x128xi1>, vector<16x128xf32>
    %35 = vector.extract_strided_slice %19 {offsets = [0, 0], sizes = [1, 128], strides = [1, 1]} : vector<3x128xf32> to vector<1x128xf32>
    %36 = vector.broadcast %35 : vector<1x128xf32> to vector<16x128xf32>
    %37 = arith.mulf %34, %36 : vector<16x128xf32>
    %38 = arith.addf %27, %37 : vector<16x128xf32>
    %c1_i32 = arith.constant 1 : i32
    %39 = tpu.dynamic_rotate %18 by %c1_i32 dim 0 : vector<16x128xf32>, i32 -> vector<16x128xf32>
    %c1_i32_16 = arith.constant 1 : i32
    %40 = tpu.dynamic_rotate %20 by %c1_i32_16 dim 0 : vector<16x128xf32>, i32 -> vector<16x128xf32>
    %c1_i32_17 = arith.constant 1 : i32
    %41 = vector.broadcast %c1_i32_17 : i32 to vector<16x1xi32>
    %42 = arith.cmpi sge, %21, %41 : vector<16x1xi32>
    %43 = vector.shape_cast %42 : vector<16x1xi1> to vector<16x1xi1>
    %44 = vector.broadcast %43 : vector<16x1xi1> to vector<16x128xi1>
    %45 = arith.select %44, %39, %40 : vector<16x128xi1>, vector<16x128xf32>
    %46 = vector.extract_strided_slice %19 {offsets = [1, 0], sizes = [1, 128], strides = [1, 1]} : vector<3x128xf32> to vector<1x128xf32>
    %47 = vector.broadcast %46 : vector<1x128xf32> to vector<16x128xf32>
    %48 = arith.mulf %45, %47 : vector<16x128xf32>
    %49 = arith.addf %38, %48 : vector<16x128xf32>
    %c0_18 = arith.constant 0 : index
    %c0_19 = arith.constant 0 : index
    %50 = vector.load %arg10[%c0_18, %c0_19] : memref<16x128xf32, #tpu.memory_space<vmem>>, vector<16x128xf32>
    tpu.vector_store %arg10[%c0_18, %c0_19], %18 {strides = array<i32>} : memref<16x128xf32, #tpu.memory_space<vmem>>, vector<16x128xf32>,
    %51 = arith.truncf %49 : vector<16x128xf32> to vector<16x128xbf16>
    %c0_20 = arith.constant 0 : index
    %c0_21 = arith.constant 0 : index
    %c0_22 = arith.constant 0 : index
    %52 = vector.load %arg7[%c0_20, %c0_21, %c0_22] : memref<1x16x128xbf16, #tpu.memory_space<vmem>>, vector<1x16x128xbf16>
    %53 = vector.shape_cast %52 : vector<1x16x128xbf16> to vector<16x128xbf16>
    %54 = vector.shape_cast %51 : vector<16x128xbf16> to vector<1x16x128xbf16>
    tpu.vector_store %arg7[%c0_20, %c0_21, %c0_22], %54 {strides = array<i32>} : memref<1x16x128xbf16, #tpu.memory_space<vmem>>, vector<1x16x128xbf16>,
    %c0_23 = arith.constant 0 : index
    %c0_24 = arith.constant 0 : index
    %c0_25 = arith.constant 0 : index
    %55 = vector.load %arg8[%c0_23, %c0_24, %c0_25] : memref<1x1x128xf32, #tpu.memory_space<vmem>>, vector<1x1x128xf32>
    %56 = vector.shape_cast %55 : vector<1x1x128xf32> to vector<1x128xf32>
    %cst_26 = arith.constant dense<0.000000e+00> : vector<128xf32>
    %57 = vector.multi_reduction <add>, %49, %cst_26 [0] : vector<16x128xf32> to vector<128xf32>
    %58 = vector.shape_cast %57 : vector<128xf32> to vector<1x128xf32>
    %59 = arith.addf %56, %58 : vector<1x128xf32>
    %c0_27 = arith.constant 0 : index
    %c0_28 = arith.constant 0 : index
    %c0_29 = arith.constant 0 : index
    %60 = vector.load %arg8[%c0_27, %c0_28, %c0_29] : memref<1x1x128xf32, #tpu.memory_space<vmem>>, vector<1x1x128xf32>
    %61 = vector.shape_cast %60 : vector<1x1x128xf32> to vector<1x128xf32>
    %62 = vector.shape_cast %59 : vector<1x128xf32> to vector<1x1x128xf32>
    tpu.vector_store %arg8[%c0_27, %c0_28, %c0_29], %62 {strides = array<i32>} : memref<1x1x128xf32, #tpu.memory_space<vmem>>, vector<1x1x128xf32>,
    %c0_30 = arith.constant 0 : index
    %c0_31 = arith.constant 0 : index
    %c0_32 = arith.constant 0 : index
    %63 = vector.load %arg9[%c0_30, %c0_31, %c0_32] : memref<1x1x128xf32, #tpu.memory_space<vmem>>, vector<1x1x128xf32>
    %64 = vector.shape_cast %63 : vector<1x1x128xf32> to vector<1x128xf32>
    %65 = arith.mulf %49, %49 : vector<16x128xf32>
    %cst_33 = arith.constant dense<0.000000e+00> : vector<128xf32>
    %66 = vector.multi_reduction <add>, %65, %cst_33 [0] : vector<16x128xf32> to vector<128xf32>
    %67 = vector.shape_cast %66 : vector<128xf32> to vector<1x128xf32>
    %68 = arith.addf %64, %67 : vector<1x128xf32>
    %c0_34 = arith.constant 0 : index
    %c0_35 = arith.constant 0 : index
    %c0_36 = arith.constant 0 : index
    %69 = vector.load %arg9[%c0_34, %c0_35, %c0_36] : memref<1x1x128xf32, #tpu.memory_space<vmem>>, vector<1x1x128xf32>
    %70 = vector.shape_cast %69 : vector<1x1x128xf32> to vector<1x128xf32>
    %71 = vector.shape_cast %68 : vector<1x128xf32> to vector<1x1x128xf32>
    tpu.vector_store %arg9[%c0_34, %c0_35, %c0_36], %71 {strides = array<i32>} : memref<1x1x128xf32, #tpu.memory_space<vmem>>, vector<1x1x128xf32>,
    return
  }
  func.func @transform_0(%arg0: i32, %arg1: i32) -> (i32, i32, i32) {
    %c0_i32 = arith.constant 0 : i32
    %c0_i32_0 = arith.constant 0 : i32
    return %arg0, %arg1, %c0_i32 : i32, i32, i32
  }
  func.func @transform_1(%arg0: i32, %arg1: i32) -> (i32, i32) {
    %c0_i32 = arith.constant 0 : i32
    %c0_i32_0 = arith.constant 0 : i32
    %c0_i32_1 = arith.constant 0 : i32
    return %c0_i32, %c0_i32_0 : i32, i32
  }
  func.func @transform_2(%arg0: i32, %arg1: i32) -> (i32, i32) {
    %c0_i32 = arith.constant 0 : i32
    %c0_i32_0 = arith.constant 0 : i32
    %c0_i32_1 = arith.constant 0 : i32
    return %c0_i32, %c0_i32_0 : i32, i32
  }
  func.func @transform_3(%arg0: i32, %arg1: i32) -> (i32, i32) {
    %c0_i32 = arith.constant 0 : i32
    %c0_i32_0 = arith.constant 0 : i32
    %c0_i32_1 = arith.constant 0 : i32
    return %c0_i32, %c0_i32_0 : i32, i32
  }
  func.func @transform_4(%arg0: i32, %arg1: i32) -> (i32, i32) {
    %c0_i32 = arith.constant 0 : i32
    %c0_i32_0 = arith.constant 0 : i32
    %c0_i32_1 = arith.constant 0 : i32
    return %c0_i32, %c0_i32_0 : i32, i32
  }
  func.func @transform_5(%arg0: i32, %arg1: i32) -> (i32, i32, i32) {
    %c0_i32 = arith.constant 0 : i32
    %c0_i32_0 = arith.constant 0 : i32
    return %arg0, %arg1, %c0_i32 : i32, i32, i32
  }
  func.func @transform_6(%arg0: i32, %arg1: i32) -> (i32, i32, i32) {
    %c0_i32 = arith.constant 0 : i32
    %c0_i32_0 = arith.constant 0 : i32
    %c0_i32_1 = arith.constant 0 : i32
    return %arg0, %c0_i32, %c0_i32_0 : i32, i32, i32
  }
  func.func @transform_7(%arg0: i32, %arg1: i32) -> (i32, i32, i32) {
    %c0_i32 = arith.constant 0 : i32
    %c0_i32_0 = arith.constant 0 : i32
    %c0_i32_1 = arith.constant 0 : i32
    return %arg0, %c0_i32, %c0_i32_0 : i32, i32, i32
  }
}

</mosaic_0001>

<bundles_post_ra>
// kernel: tpu_custom_call.1
= control target key start
LH: loop header
LB: loop body
LE: loop exit
PB: predicated region body
PF: predicated region fallthrough
CT: control target
= control target key end

     0   :  { %s1577_s0 = inlined_call_operand.hbm [shape: f32[2,16,128], index: 0, kind: input, shape index: {}]   ;;  %s1578_s1 = inlined_call_operand.hbm [shape: bf16[128,256], index: 1, kind: input, shape index: {}]   ;;  %s1579_s2 = inlined_call_operand.vmem [shape: f32[1,256], index: 2, kind: input, shape index: {}]   ;;  %s1580_s3 = inlined_call_operand.vmem [shape: f32[3,128], index: 3, kind: input, shape index: {}]   ;;  %s1581_s4 = inlined_call_operand.vmem [shape: f32[1,128], index: 4, kind: input, shape index: {}]   ;;  %s1582_s5 = inlined_call_operand.hbm [shape: bf16[2,16,128], index: 5, kind: output, shape index: {0}]   ;;  %s1583_s6 = inlined_call_operand.hbm [shape: f32[2,1,128], index: 6, kind: output, shape index: {1}]   ;;  %s1584_s7 = inlined_call_operand.hbm [shape: f32[2,1,128], index: 7, kind: output, shape index: {2}]  }
   0x1   :  { %1591 = sst [smem:[#allocation16_spill]] %s1578_s1 }
   0x2   :  { %13 = vsyncpa [#allocation4], 0 }
   0x3   :  { %15 = vsyncpa [#allocation4 + $0x1], 0 }
   0x4   :  { %16 = vsyncpa [#allocation7], 0 }
   0x5   :  { %17 = vsyncpa [#allocation5], 0 }
   0x6   :  { %19 = vsyncpa [#allocation5 + $0x1], 0 }
   0x7   :  { %20 = vsyncpa [#allocation10], 0 }
   0x8   :  { %22 = vsyncpa [#allocation10 + $0x1], 0  ;;  %s1257_s24 = smov 0   ;;  %s1259_s25 = smov 0  }
   0x9   :  { %s1261_s26 = smov 0   ;;  %s1263_s27 = smov 0  }
   0xa   :  { %s1265_s28 = smov 0   ;;  %s1267_s29 = smov 0  }
   0xb LB: > { %s1288_s30 = sadd.s32 4294967295, %s1204_s29   ;;  %s1588_s8 = sadd.s32 4294967294, %s1204_s29   ;;  %s1204_s29 = sphi %s1267_s29, %s28_s29   ;;  %s1200_s28 = sphi %s1265_s28, %s1615_s28   ;;  %s1196_s27 = sphi %s1263_s27, %s1614_s27   ;;  %s1192_s26 = sphi %s1261_s26, %s1613_s26   ;;  %s1188_s25 = sphi %s1259_s25, %s1612_s25   ;;  %s1184_s24 = sphi %s1257_s24, %s1611_s24  }
   0xc   : > { %p62_p0 = scmp.ne.s32.totalorder %s1188_s25, %s1184_s24  ;;  %p1585_p1 = scmp.eq.s32.totalorder %s1288_s30, 0 }
   0xd   : > { %p178_p3 = scmp.eq.s32.totalorder %s1588_s8, 1  ;;  %p832_p5 = scmp.ge.s32.totalorder %s1204_s29, 1 }
   0xe   : > { %p1299_p4 = por %p1585_p1, %p62_p0  ;;  %p237_p7 = scmp.lt.s32.totalorder %s1204_s29, 3 }
   0xf   : > { %p1304_p6 = por %p178_p3, %p62_p0  ;;  %s1206_s12 = smov [#allocation6]  }
  0x10   : > { %s1592_s9 = scalar_select %p1299_p4, 1, 0 }
  0x11   : > { %s1593_s10 = scalar_select %p1304_p6, 1, 0 }
  0x12   : > { %p1309_p8 = pnand %p832_p5, %p237_p7  ;;  %s249_s13 = sshll.u32 %s1206_s12, 4  ;;  %s250_s13 = int_to_ptr.vmem [resolvable:$true] %s249_s13 }
  0x13   : > { %s40_s15 = sadd.s32 1, %s1200_s28  ;;  %s1596_s1 = sld [smem:[#allocation16_spill]] }
  0x14   : > { %s1594_s11 = scalar_select %p1309_p8, 1, 0 }
  0x15   : > { %p891_p9 = pneg %p1309_p8 }
  0x17   : > { %p1318_p11 = pnand %p891_p9, %p1585_p1 }
  0x19   : > { %s1000_s18 = scalar_lea.hbm %s1596_s1, 2048  ;;  %p1002_p13 = pneg %p1318_p11 }
  0x1a   : > { %p1001_p12 = scmp.ne.s32.totalorder %s1596_s1, %s1000_s18  ;;  %p1007_p5 = scmp.lt.u32.totalorder %s1000_s18, %s1596_s1 }
  0x1c   : > { %p1003_p0 = pnand %p1002_p13, %p1001_p12 }
  0x1e   : > { %p1004_p3 = pneg %p1003_p0 }
  0x20   : > { %p1009_p7 = pnand %p1007_p5, %p1004_p3 }
  0x22   : > { %1012 = shalt.err (!%p1009_p7)
}
  0x23   : > { %s1013_s23 = scalar_lea.vmem %s250_s13, 2048  ;;  %p1021_p2 = scmp.lt.s32.totalorder %s250_s13, %s250_s13 }
  0x24   : > { %p1014_p9 = scmp.ne.s32.totalorder %s250_s13, %s1013_s23  ;;  %p1022_p6 = scmp.lt.s32.totalorder %s1013_s23, %s1013_s23 }
  0x26   : > { %p1016_p10 = pnand %p1014_p9, %p1002_p13  ;;  %p1023_p4 = por %p1022_p6, %p1021_p2 }
  0x28   : > { %p1017_p1 = pneg %p1016_p10 }
  0x2a   : > { %p1024_p8 = pnand %p1023_p4, %p1017_p1 }
  0x2c   : > { %1027 = shalt.err (!%p1024_p8)
}
  0x2d   : > { %s1589_s12 = smov 128   ;;  %s1590_s16 = smov 8  }
  0x2e   : > { %894 = dma.hbm_to_vmem [thread:$0]  (!%p1318_p11), %s1596_s1, 2048, %s250_s13, [#allocation7], %s1589_s12, %s1589_s12, %s1590_s16  }
  0x2f   : > { %p42_p1 = scmp.ge.s32.totalorder %s40_s15, 2  ;;  %s49_s19 = sadd.s32 1, %s1192_s26 }
  0x30   : > { %p56_p2 = scmp.ne.s32.totalorder %s1192_s26, %s1188_s25  ;;  %p57_p4 = scmp.eq.s32.totalorder %s1204_s29, 0 }
  0x31   : > { %s1617_s15 = smov (%p42_p1, %s40_s15), 0  ;;  %p1598_p8 = scmp.eq.s32.totalorder %s1288_s30, 1 }
  0x32   : > { %p1348_p6 = por %p57_p4, %p56_p2  ;;  %s44_s21 = ssub.s32 %s1200_s28, %s1617_s15 }
  0x33   : > { %p1354_p10 = por %p1598_p8, %p56_p2  ;;  %p910_p12 = scmp.lt.s32.totalorder %s1204_s29, 2 }
  0x34   : > { %p47_p11 = scmp.eq.s32.totalorder %s44_s21, 0  ;;  %s272_s13 = sand.u32 1, %s1192_s26  }
  0x35   : > { %s835_s22 = sshll.u32 %s272_s13, 4  ;;  %s870_s17 = sshll.u32 %s1200_s28, 8 }
  0x36   : > { %s1363_s23 = scalar_select %p47_p11, %s1192_s26, %s49_s19  }
  0x37   : > { %s1369_s12 = scalar_lea.hbm %s1577_s0, %s870_s17  ;;  %s276_s16 = scalar_lea.vmem [#allocation3], %s835_s22 }
  0x38   : > { %s285_s1 = sshll.u32 %s276_s16, 4  ;;  %p1375_p13 = pnand %p910_p12, %p1348_p6  ;;  %s1371_s1 = int_to_ptr.vmem [resolvable:$true] %s285_s1 }
  0x39   : > { %s1379_s19 = scalar_lea.sflag [#allocation4], %s272_s13  ;;  %s1028_s8 = scalar_lea.hbm %s1369_s12, 256 }
  0x3a   : > { %p1029_p0 = scmp.ne.s32.totalorder %s1369_s12, %s1028_s8  ;;  %p1030_p3 = pneg %p1375_p13 }
  0x3b   : > { %s1033_s20 = scalar_lea.hbm %s1577_s0, 512  ;;  %p1034_p9 = scmp.lt.u32.totalorder %s1369_s12, %s1577_s0 }
  0x3c   : > { %p1031_p5 = pnand %p1030_p3, %p1029_p0  ;;  %p1035_p1 = scmp.lt.u32.totalorder %s1033_s20, %s1028_s8 }
  0x3d   : > { %p1037_p4 = scmp.lt.u32.totalorder %s1028_s8, %s1369_s12 }
  0x3e   : > { %p1032_p7 = pneg %p1031_p5  ;;  %p1036_p2 = por %p1035_p1, %p1034_p9 }
  0x40   : > { %p1038_p6 = por %p1037_p4, %p1036_p2 }
  0x42   : > { %p1039_p8 = pnand %p1038_p6, %p1032_p7 }
  0x44   : > { %1042 = shalt.err (!%p1039_p8)
}
  0x45   : > { %s1043_s13 = scalar_lea.vmem %s1371_s1, 256  ;;  %s1209_s16 = smov [#allocation3]  }
  0x46   : > { %p1044_p12 = scmp.ne.s32.totalorder %s1371_s1, %s1043_s13  ;;  %s1048_s22 = sshll.u32 %s1209_s16, 4  ;;  %s1049_s22 = int_to_ptr.vmem [resolvable:$false] %s1048_s22 }
  0x47   : > { %s1050_s17 = scalar_lea.vmem %s1049_s22, 512  ;;  %p1051_p5 = scmp.lt.s32.totalorder %s1371_s1, %s1049_s22 }
  0x48   : > { %p1046_p11 = pnand %p1044_p12, %p1030_p3  ;;  %p1052_p9 = scmp.lt.s32.totalorder %s1050_s17, %s1043_s13 }
  0x4a   : > { %p1047_p0 = pneg %p1046_p11  ;;  %p1053_p1 = por %p1052_p9, %p1051_p5 }
  0x4c   : > { %p1054_p2 = pnand %p1053_p1, %p1047_p0 }
  0x4e   : > { %1057 = shalt.err (!%p1054_p2)
}
  0x4f   : > { %s1601_s8 = smov 8   ;;  %s1602_s20 = smov 128  }
  0x50   : > { %898 = dma.hbm_to_vmem [thread:$0]  (!%p1375_p13), %s1369_s12, 256, %s1371_s1, %s1379_s19, %s1602_s20, %s1602_s20, %s1601_s8  }
  0x51   : > { %p1603_p3 = scmp.ne.s32.totalorder %s1594_s11, 0 }
  0x52   : > { %s1413_s18 = sand.u32 (!%p1603_p3), 1, %s1188_s25   ;;  %p1604_p7 = scmp.ne.s32.totalorder (!%p1603_p3), %s1592_s9, 0 }
  0x53   : > { %297 = sbr.rel (%p1603_p3) target bundleno = 447 (0x1bf), region = 40  ;;  %s839_s13 = sshll.u32 (!%p1603_p3), %s1413_s18, 4 }
  0x54   : > { %s300_s16 = scalar_lea.sflag (!%p1603_p3), [#allocation4], %s1413_s18  ;;  %s1417_s22 = scalar_lea.vmem (!%p1603_p3), [#allocation3], %s839_s13 }
  0x5a   : > { %1167 = dma.done.wait (%p1604_p7), %s300_s16, 256  }
  0x5b   : > { %1169 = vsyncadd (%p1604_p7), %s300_s16, 4294967040  ;;  %p1605_p13 = scmp.eq.s32.totalorder %s1288_s30, 0 }
  0x5d   : > { %1171 = dma.done.wait (%p1605_p13), [#allocation7], 2048   ;;  %p1606_p4 = pmov %p1605_p13 }
  0x5e   : > { %v1210_v0 = vmov 0   ;;  %v968_v1 = vld [vmem:[#allocation6 + $0x4] ss:$8 sps:$4 sm:$0xff]   ;;  %v970_v2 = vld [vmem:[#allocation6] ss:$8 sps:$4 sm:$0xff]   ;;  %s1430_s1 = scalar_lea.vmem [#allocation9], %s1413_s18  ;;  %v378_v21 = vlaneseq }
  0x5f   : > { %1173 = vsyncadd (%p1606_p4), [#allocation7], 4294965248  ;;  %500 = vmatprep.mubr.bf16.mxu0 %v1210_v0  ;;  %468 = vmatprep.subr.bf16.mxu0 %v968_v1  ;;  %v971_v3 = vld [vmem:[#allocation6 + $0x14] ss:$8 sps:$4 sm:$0xff]   ;;  %v973_v4 = vld [vmem:[#allocation6 + $0x10] ss:$8 sps:$4 sm:$0xff]  }
  0x60   : > { %469 = vmatpush1.bf16.msra.mxu0 %v970_v2  ;;  %v974_v5 = vld [vmem:[#allocation6 + $0x24] ss:$8 sps:$4 sm:$0xff]   ;;  %v976_v6 = vld [vmem:[#allocation6 + $0x20] ss:$8 sps:$4 sm:$0xff]   ;;  %v977_v7 = vld [vmem:[#allocation6 + $0x34] ss:$8 sps:$4 sm:$0xff]  }
  0x61   : > { %470 = vmatprep.subr.bf16.mxu0 %v971_v3  ;;  %v979_v8 = vld [vmem:[#allocation6 + $0x30] ss:$8 sps:$4 sm:$0xff]   ;;  %v980_v9 = vld [vmem:[#allocation6 + $0x44] ss:$8 sps:$4 sm:$0xff]   ;;  %v982_v10 = vld [vmem:[#allocation6 + $0x40] ss:$8 sps:$4 sm:$0xff]  }
  0x62   : > { %v983_v11 = vld [vmem:[#allocation6 + $0x54] ss:$8 sps:$4 sm:$0xff]   ;;  %v985_v12 = vld [vmem:[#allocation6 + $0x50] ss:$8 sps:$4 sm:$0xff]   ;;  %v986_v13 = vld [vmem:[#allocation6 + $0x64] ss:$8 sps:$4 sm:$0xff]  }
  0x63   : > { %v988_v14 = vld [vmem:[#allocation6 + $0x60] ss:$8 sps:$4 sm:$0xff]   ;;  %v989_v15 = vld [vmem:[#allocation6 + $0x74] ss:$8 sps:$4 sm:$0xff]   ;;  %v991_v16 = vld [vmem:[#allocation6 + $0x70] ss:$8 sps:$4 sm:$0xff]  }
  0x64   : > { %471 = vmatpush1.bf16.msra.mxu0 %v973_v4  ;;  %v357_v17 = vld [vmem:[%s1417_s22] sm:$0xff]  ;;  %v358_v18 = vld [vmem:[%s1417_s22 + $0x8] sm:$0xff]  ;;  %v1211_v20 = vmov 0.0   ;;  %s1434_s9 = scalar_lea.vmem [#allocation11], %s1413_s18  ;;  %v379_v22 = vshrl.u32 %v378_v21, 7  ;;  %s841_s20 = sshll.u32 %s1413_s18, 3 }
  0x65   : > { %472 = vmatprep.subr.bf16.mxu0 %v974_v5  ;;  %v359_v19 = vpack.c.bf16 %v358_v18, %v357_v17  ;;  %355 = vst [vmem:[%s1430_s1] sm:$0x1] %v1211_v20  ;;  %356 = vst [vmem:[%s1434_s9] sm:$0x1] %v1211_v20  ;;  %v376_v24 = vld [vmem:[%s1579_s2] sm:$0x3]  ;;  %v551_v50 = vrot.slane %v1211_v20, 6  ;;  %v576_v53 = vrot.slane %v1211_v20, 7 }
  0x66   : > { %v384_v23 = vsub.s32 1, %v379_v22  ;;  %v380_v38 = vsub.s32 0, %v379_v22  ;;  %v533_v40 = vsub.s32 2, %v379_v22  ;;  %v525_v41 = vld [vmem:[%s1580_s3] sm:$0x7]  ;;  %vm548_vm0 = vcmp.lt.s32.totalorder %v379_v22, 2 }
  0x67   : > { %vm573_vm1 = vcmp.lt.s32.totalorder %v379_v22, 1  ;;  %vm555_vm2 = vcmp.ge.s32.totalorder %v379_v22, 2  ;;  %v860_v58 = vld [vmem:[%s1581_s4] ss:$0 sm:$0xff]  ;;  %vm580_vm3 = vcmp.ge.s32.totalorder %v379_v22, 1  ;;  %s873_s13 = sshll.u32 %s1196_s27, 7 }
  0x68   : > { %473 = vmatpush1.bf16.msra.mxu0 %v976_v6  ;;  %v385_v25 = vrot.slane %v376_v24, %v384_v23  ;;  %v381_v39 = vrot.slane %v376_v24, %v380_v38  ;;  %v534_v44 = vrot.slane %v525_v41, %v533_v40  ;;  %v566_v48 = vrot.slane %v525_v41, %v380_v38  ;;  %s333_s16 = scalar_lea.vmem [#allocation8], %s841_s20  ;;  %s1456_s21 = scalar_lea.hbm %s1582_s5, %s873_s13 }
  0x69   : > { %474 = vmatprep.subr.bf16.mxu0 %v977_v7  ;;  %v591_v59 = vrot.slane %v525_v41, %v384_v23  ;;  %s654_s22 = sshll.u32 %s333_s16, 4  ;;  %s1212_s8 = smov [#allocation8]   ;;  %s1458_s22 = int_to_ptr.vmem [resolvable:$true] %s654_s22 }
  0x6a   : > { %s1058_s17 = scalar_lea.vmem %s1458_s22, 128  ;;  %s1062_s20 = sshll.u32 %s1212_s8, 4  ;;  %s1063_s20 = int_to_ptr.vmem [resolvable:$false] %s1062_s20 }
  0x6b   : > { %p1059_p6 = scmp.ne.s32.totalorder %s1458_s22, %s1058_s17  ;;  %s1064_s13 = scalar_lea.vmem %s1063_s20, 256 }
  0x6c   : > { %475 = vmatpush1.bf16.msra.mxu0 %v979_v8  ;;  %p1065_p11 = scmp.lt.s32.totalorder %s1458_s22, %s1063_s20  ;;  %p1066_p0 = scmp.lt.s32.totalorder %s1064_s13, %s1058_s17 }
  0x6d   : > { %476 = vmatprep.subr.bf16.mxu0 %v980_v9  ;;  %p1060_p8 = pnand %p1059_p6, %p1354_p10 }
  0x6e   : > { %p1067_p5 = por %p1066_p0, %p1065_p11 }
  0x6f   : > { %p1061_p12 = pneg %p1060_p8 }
  0x70   : > { %477 = vmatpush1.bf16.msra.mxu0 %v982_v10 }
  0x71   : > { %478 = vmatprep.subr.bf16.mxu0 %v983_v11  ;;  %p1068_p9 = pnand %p1067_p5, %p1061_p12 }
  0x74   : > { %479 = vmatpush1.bf16.msra.mxu0 %v985_v12 }
  0x75   : > { %480 = vmatprep.subr.bf16.mxu0 %v986_v13 }
  0x78   : > { %481 = vmatpush1.bf16.msra.mxu0 %v988_v14 }
  0x79   : > { %482 = vmatprep.subr.bf16.mxu0 %v989_v15 }
  0x7c   : > { %483 = vmatpush1.bf16.msra.mxu0 %v991_v16 }
  0x7f   : > { %501 = vmatmul.mubr.bf16.vlgmr.msra.gmra.mrb[0].mxu0 %v359_v19 }
 0x152   : > { %v502_v26 = vpop.f32.mrb[0].mxu0 }
 0x153   : > { %v504_v27 = vpop.f32.mrb[1].mxu0  ;;  %v503_v42 = vadd.f32 %v502_v26, %v381_v39 }
 0x154   : > { %v505_v28 = vadd.f32 %v504_v27, %v385_v25  ;;  %v506_v29 = vpop.f32.mrb[2].mxu0 }
 0x155   : > { %v508_v30 = vpop.f32.mrb[3].mxu0  ;;  %v507_v46 = vadd.f32 %v506_v29, %v381_v39 }
 0x156   : > { %v858_v31 = vmul.f32 -1.442695, %v505_v28  ;;  %v509_v32 = vadd.f32 %v508_v30, %v385_v25 }
 0x158   : > { %992 = vpow2.f32 %v858_v31  ;;  %v859_v33 = vmul.f32 -1.442695, %v509_v32 }
 0x15a   : > { %994 = vpow2.f32 %v859_v33 }
 0x162   : > { %v993_v34 = vpop.eup %992 }
 0x163   : > { %v517_v35 = vadd.f32 1.0, %v993_v34 }
 0x164   : > { %v995_v36 = vpop.eup %994 }
 0x165   : > { %996 = vrcp.f32 %v517_v35  ;;  %v518_v37 = vadd.f32 1.0, %v995_v36 }
 0x167   : > { %998 = vrcp.f32 %v518_v37 }
 0x16f   : > { %v997_v43 = vpop.eup %996 }
 0x170   : > { %v523_v45 = vmul.f32 %v997_v43, %v503_v42 }
 0x171   : > { %v999_v47 = vpop.eup %998 }
 0x172   : > { %v524_v49 = vmul.f32 %v999_v47, %v507_v46  ;;  %v535_v51 = vmul.f32 %v534_v44, %v523_v45  ;;  %v546_v52 = vrot.slane %v523_v45, 6  ;;  %v571_v54 = vrot.slane %v523_v45, 7 }
 0x174   : > { %v536_v55 = vmul.f32 %v534_v44, %v524_v49  ;;  %v547_v56 = vrot.slane %v524_v49, 6  ;;  %v572_v57 = vrot.slane %v524_v49, 7  ;;  %v544_v3 = vadd.f32 %v860_v58, %v535_v51 }
 0x176   : > { %v545_v60 = vadd.f32 %v860_v58, %v536_v55  ;;  %v549_v61 = vsel %vm548_vm0, %v546_v52, %v547_v56  ;;  %v550_v62 = vsel %vm548_vm0, %v547_v56, %v546_v52  ;;  %v574_v63 = vsel %vm573_vm1, %v571_v54, %v572_v57 }
 0x177   : > { %v568_v0 = vmul.f32 %v566_v48, %v549_v61  ;;  %v575_v1 = vsel %vm573_vm1, %v572_v57, %v571_v54  ;;  %v561_v2 = vsel %vm555_vm2, %v550_v62, %v551_v50  ;;  %v593_v7 = vmul.f32 %v591_v59, %v574_v63 }
 0x178   : > { %v567_v4 = vmul.f32 %v566_v48, %v561_v2  ;;  %v586_v5 = vsel %vm580_vm3, %v575_v1, %v576_v53 }
 0x179   : > { %v570_v6 = vadd.f32 %v568_v0, %v545_v60  ;;  %v592_v9 = vmul.f32 %v591_v59, %v586_v5 }
 0x17a   : > { %v569_v8 = vadd.f32 %v567_v4, %v544_v3 }
 0x17b   : > { %v595_v10 = vadd.f32 %v593_v7, %v570_v6 }
 0x17c   : > { %v594_v11 = vadd.f32 %v592_v9, %v569_v8 }
 0x17d   : > { %v620_v12 = vmul.f32 %v595_v10, %v595_v10 }
 0x17e   : > { %v609_v13 = vadd.f32 %v595_v10, %v594_v11  ;;  %v877_v14 = vpack.c.bf16 %v595_v10, %v594_v11  ;;  %v619_v15 = vmul.f32 %v594_v11, %v594_v11 }
 0x180   : > { %v610_v16 = vrot.slane %v609_v13, 4  ;;  %878 = vst [vmem:[%s333_s16] sm:$0xff] %v877_v14   ;;  %v621_v17 = vadd.f32 %v620_v12, %v619_v15 }
 0x181   : > { %1071 = shalt.err (!%p1068_p9)
}
 0x182   : > { %s1072_s16 = scalar_lea.hbm %s1456_s21, 128  ;;  %s1076_s8 = scalar_lea.hbm %s1582_s5, 256 }
 0x183   : > { %p1073_p1 = scmp.ne.s32.totalorder %s1456_s21, %s1072_s16  ;;  %p1077_p7 = scmp.lt.u32.totalorder %s1456_s21, %s1582_s5 }
 0x184   : > { %p1078_p13 = scmp.lt.u32.totalorder %s1076_s8, %s1072_s16  ;;  %p1080_p6 = scmp.lt.u32.totalorder %s1072_s16, %s1456_s21 }
 0x185   : > { %p1074_p2 = pnand %p1073_p1, %p1354_p10 }
 0x186   : > { %p1079_p4 = por %p1078_p13, %p1077_p7 }
 0x187   : > { %p1075_p3 = pneg %p1074_p2 }
 0x188   : > { %p1081_p8 = por %p1080_p6, %p1079_p4 }
 0x18a   : > { %p1082_p12 = pnand %p1081_p8, %p1075_p3 }
 0x18c   : > { %1085 = shalt.err (!%p1082_p12)
}
 0x18d   : > { %s1213_s17 = smov 64   ;;  %s1214_s13 = smov 4   ;;  %v611_v18 = vadd.f32 %v610_v16, %v609_v13  ;;  %v622_v19 = vrot.slane %v621_v17, 4  ;;  %v608_v26 = vld [vmem:[%s1430_s1] sm:$0x1] }
 0x18e   : > { %s1607_s11 = scalar_lea.sflag [#allocation5], %s1413_s18  ;;  %s635_s19 = sand.u32 1, %s1288_s30   ;;  %v618_v29 = vld [vmem:[%s1434_s9] sm:$0x1] }
 0x18f   : > { %885 = dma.vmem_to_hbm [thread:$0]  (%p1354_p10), %s1458_s22, 128, %s1456_s21, %s1607_s11, %s1213_s17, %s1213_s17, %s1214_s13   ;;  %v612_v20 = vrot.slane %v611_v18, 2  ;;  %v623_v21 = vadd.f32 %v622_v19, %v621_v17 }
 0x190   : > { %s866_s16 = sshll.u32 %s1196_s27, 4  ;;  %s670_s12 = sshll.u32 %s1430_s1, 4  ;;  %s1495_s12 = int_to_ptr.vmem [resolvable:$true] %s670_s12 }
 0x191   : > { %v613_v22 = vadd.f32 %v612_v20, %v611_v18  ;;  %v624_v23 = vrot.slane %v623_v21, 2  ;;  %s683_s18 = sshll.u32 %s1434_s9, 4  ;;  %s1493_s8 = scalar_lea.hbm %s1583_s6, %s866_s16  ;;  %s1503_s18 = int_to_ptr.vmem [resolvable:$true] %s683_s18 }
 0x192   : > { %s1501_s20 = scalar_lea.hbm %s1584_s7, %s866_s16  ;;  %s1505_s17 = scalar_lea.sflag [#allocation10], %s635_s19 }
 0x193   : > { %v614_v24 = vrot.slane %v613_v22, 1  ;;  %v625_v25 = vadd.f32 %v624_v23, %v623_v21  ;;  %s1086_s13 = scalar_lea.vmem %s1495_s12, 16  ;;  %s1215_s11 = smov [#allocation9]  }
 0x194   : > { %p1087_p11 = scmp.ne.s32.totalorder %s1495_s12, %s1086_s13  ;;  %s1090_s22 = sshll.u32 %s1215_s11, 4  ;;  %s1091_s22 = int_to_ptr.vmem [resolvable:$false] %s1090_s22 }
 0x195   : > { %v615_v27 = vadd.f32 %v614_v24, %v613_v22  ;;  %v626_v28 = vrot.slane %v625_v25, 1  ;;  %s1092_s21 = scalar_lea.vmem %s1091_s22, 32  ;;  %p1093_p9 = scmp.lt.s32.totalorder %s1495_s12, %s1091_s22 }
 0x196   : > { %p1088_p0 = pnand %p1087_p11, %p1354_p10  ;;  %p1094_p1 = scmp.lt.s32.totalorder %s1092_s21, %s1086_s13 }
 0x197   : > { %v616_v30 = vadd.f32 %v615_v27, %v608_v26  ;;  %v627_v31 = vadd.f32 %v626_v28, %v625_v25 }
 0x198   : > { %p1089_p5 = pneg %p1088_p0  ;;  %p1095_p2 = por %p1094_p1, %p1093_p9 }
 0x199   : > { %617 = vst [vmem:[%s1430_s1] sm:$0x1] %v616_v30  ;;  %v628_v32 = vadd.f32 %v627_v31, %v618_v29 }
 0x19a   : > { %p1096_p3 = pnand %p1095_p2, %p1089_p5 }
 0x19c   : > { %1099 = shalt.err (!%p1096_p3)
}
 0x19d   : > { %s1100_s1 = scalar_lea.hbm %s1493_s8, 16  ;;  %s1104_s27 = scalar_lea.hbm %s1583_s6, 32 }
 0x19e   : > { %p1101_p7 = scmp.ne.s32.totalorder %s1493_s8, %s1100_s1  ;;  %p1105_p6 = scmp.lt.u32.totalorder %s1493_s8, %s1583_s6 }
 0x19f   : > { %p1106_p8 = scmp.lt.u32.totalorder %s1104_s27, %s1100_s1  ;;  %p1108_p11 = scmp.lt.u32.totalorder %s1100_s1, %s1493_s8 }
 0x1a0   : > { %p1102_p13 = pnand %p1101_p7, %p1354_p10 }
 0x1a1   : > { %p1107_p12 = por %p1106_p8, %p1105_p6 }
 0x1a2   : > { %p1103_p4 = pneg %p1102_p13 }
 0x1a3   : > { %p1109_p0 = por %p1108_p11, %p1107_p12 }
 0x1a5   : > { %p1110_p5 = pnand %p1109_p0, %p1103_p4 }
 0x1a7   : > { %1113 = shalt.err (!%p1110_p5)
}
 0x1a8   : > { %886 = dma.vmem_to_hbm [thread:$0]  (%p1354_p10), %s1495_s12, 16, %s1493_s8, %s1505_s17   ;;  %629 = vst [vmem:[%s1434_s9] sm:$0x1] %v628_v32 }
 0x1a9   : > { %s1114_s13 = scalar_lea.vmem %s1503_s18, 16  ;;  %s1216_s22 = smov [#allocation11]  }
 0x1aa   : > { %p1115_p9 = scmp.ne.s32.totalorder %s1503_s18, %s1114_s13  ;;  %s1118_s21 = sshll.u32 %s1216_s22, 4  ;;  %s1119_s21 = int_to_ptr.vmem [resolvable:$false] %s1118_s21 }
 0x1ab   : > { %s1120_s1 = scalar_lea.vmem %s1119_s21, 32  ;;  %p1121_p3 = scmp.lt.s32.totalorder %s1503_s18, %s1119_s21 }
 0x1ac   : > { %p1116_p1 = pnand %p1115_p9, %p1354_p10  ;;  %p1122_p7 = scmp.lt.s32.totalorder %s1120_s1, %s1114_s13 }
 0x1ae   : > { %p1117_p2 = pneg %p1116_p1  ;;  %p1123_p13 = por %p1122_p7, %p1121_p3 }
 0x1b0   : > { %p1124_p4 = pnand %p1123_p13, %p1117_p2 }
 0x1b2   : > { %1127 = shalt.err (!%p1124_p4)
}
 0x1b3   : > { %s1128_s9 = scalar_lea.hbm %s1501_s20, 16  ;;  %s1132_s19 = scalar_lea.hbm %s1584_s7, 32 }
 0x1b4   : > { %p1129_p6 = scmp.ne.s32.totalorder %s1501_s20, %s1128_s9  ;;  %p1133_p11 = scmp.lt.u32.totalorder %s1501_s20, %s1584_s7 }
 0x1b5   : > { %p1134_p0 = scmp.lt.u32.totalorder %s1132_s19, %s1128_s9  ;;  %p1136_p9 = scmp.lt.u32.totalorder %s1128_s9, %s1501_s20 }
 0x1b6   : > { %p1130_p8 = pnand %p1129_p6, %p1354_p10 }
 0x1b7   : > { %p1135_p5 = por %p1134_p0, %p1133_p11 }
 0x1b8   : > { %p1131_p12 = pneg %p1130_p8 }
 0x1b9   : > { %p1137_p1 = por %p1136_p9, %p1135_p5 }
 0x1bb   : > { %p1138_p2 = pnand %p1137_p1, %p1131_p12 }
 0x1bd   : > { %1141 = shalt.err (!%p1138_p2)
}
 0x1be   : > { %887 = dma.vmem_to_hbm [thread:$0]  (%p1354_p10), %s1503_s18, 16, %s1501_s20, %s1505_s17  }
 0x1bf PF: > { %s695_s30 = sand.u32 1, %s1184_s24   ;;  %p1608_p3 = scmp.ne.s32.totalorder %s1593_s10, 0 }
 0x1c0   : > { %p1609_p7 = scmp.ge.s32.totalorder %s1204_s29, 2  ;;  %s696_s11 = scalar_lea.sflag [#allocation5], %s695_s30 }
 0x1c2   : > { %p900_p13 = pnand %p1609_p7, %p1608_p3 }
 0x1c4   : > { %1175 = dma.done.wait (!%p900_p13), %s696_s11, 128  }
 0x1c5   : > { %1177 = vsyncadd (!%p900_p13), %s696_s11, 4294967168  ;;  %s1610_s13 = sadd.s32 4294967294, %s1204_s29  }
 0x1c6   : > { %s704_s22 = sand.u32 1, %s1610_s13  }
 0x1c7   : > { %s705_s21 = scalar_lea.sflag [#allocation10], %s704_s22 }
 0x1c8   : > { %1179 = dma.done.wait (!%p900_p13), %s705_s21, 32  }
 0x1c9   : > { %1181 = vsyncadd (!%p900_p13), %s705_s21, 4294967264  ;;  %s28_s29 = sadd.s32 1, %s1204_s29   ;;  %s1611_s24 = smov %s1188_s25 }
 0x1ca   : > { %p25_p10 = scmp.ge.s32.totalorder %s28_s29, 4   ;;  %s1612_s25 = smov %s1192_s26 }
 0x1cb   : > { %s1613_s26 = smov %s1363_s23  ;;  %s1614_s27 = smov %s1200_s28 }
 0x1cc   : > { %s1615_s28 = smov %s1617_s15  ;;  %27 = sbr.rel (!%p25_p10) target bundleno = 11 (0xb), region = 125 }
 0x1d3   :  { %717 = vsyncpa [#allocation4], 1 }
 0x1d4   :  { %719 = vsyncpa [#allocation4 + $0x1], 1 }
 0x1d5   :  { %720 = vsyncpa [#allocation7], 1 }
 0x1d6   :  { %721 = vsyncpa [#allocation5], 1 }
 0x1d7   :  { %723 = vsyncpa [#allocation5 + $0x1], 1 }
 0x1d8   :  { %724 = vsyncpa [#allocation10], 1 }
 0x1d9   :  { %726 = vsyncpa [#allocation10 + $0x1], 1 }

</bundles_post_ra>
